<compile_context>
chip_gen: v6e
topology: v6e:2x2x1
jax: 0.10.0
libtpu: 0.0.40
codegen_flags: <defaults>
</compile_context>

<pallas_src>
import math

import jax
import jax.numpy as jnp
import numpy as np
from jax import lax
from jax.experimental import pallas as pl
from jax.experimental.pallas import tpu as pltpu

N = 10        # cell_count in the reference module
NPAD = 128    # lane padding (fast axis)
NSUB = 16     # sublane padding (>= N, multiple of 8)


def olfactory_bulb_kernel(add_ref,    # SMEM (T,) f32 : per-step 7*inhale
                          dec_ref,    # SMEM (T,) f32 : per-step (7/33)*exp((breath-t)/33)*(1-inhale)
                          rows_ref,   # VMEM (8, NPAD): row0=odor, row1=I, row2=mitral potential
                          cols_ref,   # VMEM (NSUB, 2): col0=granule potential, col1=granule rate
                          ah_ref,     # VMEM (NSUB, NPAD): H0^T zero-padded
                          aw_ref,     # VMEM (NSUB, NPAD): W0   zero-padded
                          out_rows,   # VMEM (8, NPAD): row0=odor, row1=I, row2=mpot, row3=mitral rate
                          out_cols):  # VMEM (NSUB, 2): col0=granule potential, col1=granule rate
    odor = rows_ref[0:1, :]           # (1, NPAD), lane-dense
    ah = ah_ref[...]                  # ah[k, j] = H0[j, k]
    aw = aw_ref[...]                  # aw[j, k] = W0[j, k]
    nsteps = add_ref.shape[0]

    def gate(p, s_lo, s_hi):
        # Piecewise tanh firing-rate gate with a SINGLE tanh (select picks the scale).
        below = p < 1.0
        s = jnp.where(below, s_lo, s_hi)
        inv = jnp.where(below, 1.0 / s_lo, 1.0 / s_hi)
        return s_lo + s * jnp.tanh((p - 1.0) * inv)

    def body(step, carry):
        I, mpot, gpot, gfr = carry
        add_s = add_ref[step]                     # scalar SMEM reads
        dec = dec_ref[step]
        # Receptors: inhale -> I += 7*odor ; exhale -> I -= (7/33)*exp((breath-t)/33)*I
        I = I + add_s * odor - dec * I
        # Mitral potential: X <- X - 2*(H0 @ Vy + X/7 - I)
        # H0 @ gfr_col computed as sum over sublanes of (gfr * H0^T) -> lane-dense row.
        h0_vy = jnp.sum(gfr * ah, axis=0, keepdims=True)           # (1, NPAD)
        mpot = mpot - 2.0 * (h0_vy + mpot * (1.0 / 7.0) - I)
        mfr = gate(mpot, 0.14, 1.4)                                 # (1, NPAD)
        # Granule potential: Y <- Y + 2*(W0 @ Vx - Y/7 + 0.1)
        # W0 @ mfr_row computed as sum over lanes of (W0 * mfr) -> sublane column.
        w0_vx = jnp.sum(aw * mfr, axis=1, keepdims=True)            # (NSUB, 1)
        gpot = gpot + 2.0 * (w0_vx - gpot * (1.0 / 7.0) + 0.1)
        gfr = gate(gpot, 0.29, 2.9)                                 # (NSUB, 1)
        return I, mpot, gpot, gfr

    init = (rows_ref[1:2, :], rows_ref[2:3, :], cols_ref[:, 0:1], cols_ref[:, 1:2])
    I_f, mpot_f, gpot_f, gfr_f = lax.fori_loop(0, nsteps, body, init,
                                               unroll=min(4, nsteps))
    mfr_f = gate(mpot_f, 0.14, 1.4)   # final mitral firing rate (function of final mpot)

    # Lane-dense full-width stores once per call.
    out_rows[0:1, :] = odor
    out_rows[1:2, :] = I_f
    out_rows[2:3, :] = mpot_f
    out_rows[3:4, :] = mfr_f
    out_rows[4:8, :] = jnp.zeros((4, NPAD), jnp.float32)
    out_cols[:, 0:1] = gpot_f
    out_cols[:, 1:2] = gfr_f


@jax.jit
def olfactory_bulb_run(odor, I0, mpot0, gpot0, gfr0, H0, W0, t_arr, breath_arr, inhale_arr):
    """Run len(t_arr) OlfactoryBulb.forward steps in one kernel.

    All per-cell vectors use PyTorch's (N, 1) column convention in/out.
    Returns (I, mitral_potential, granule_potential, mitral_rate, granule_rate).
    """
    f32 = jnp.float32
    inhale = inhale_arr.astype(f32)
    t_arr = t_arr.astype(f32)
    breath_arr = breath_arr.astype(f32)
    add_scale = 7.0 * inhale
    decay = jnp.where(inhale > 0.5, 0.0,
                      (7.0 / 33.0) * jnp.exp((breath_arr - t_arr) * (1.0 / 33.0)))

    rows = jnp.zeros((8, NPAD), f32)
    rows = rows.at[0, :N].set(odor.astype(f32)[:, 0])
    rows = rows.at[1, :N].set(I0.astype(f32)[:, 0])
    rows = rows.at[2, :N].set(mpot0.astype(f32)[:, 0])
    cols = jnp.zeros((NSUB, 2), f32)
    cols = cols.at[:N, 0].set(gpot0.astype(f32)[:, 0])
    cols = cols.at[:N, 1].set(gfr0.astype(f32)[:, 0])
    ah = jnp.zeros((NSUB, NPAD), f32).at[:N, :N].set(H0.astype(f32).T)
    aw = jnp.zeros((NSUB, NPAD), f32).at[:N, :N].set(W0.astype(f32))

    smem = pl.BlockSpec(memory_space=pltpu.MemorySpace.SMEM)
    vmem = pl.BlockSpec(memory_space=pltpu.MemorySpace.VMEM)
    out_rows, out_cols = pl.pallas_call(
        olfactory_bulb_kernel,
        out_shape=(jax.ShapeDtypeStruct((8, NPAD), f32),
                   jax.ShapeDtypeStruct((NSUB, 2), f32)),
        in_specs=[smem, smem, vmem, vmem, vmem, vmem],
        out_specs=(vmem, vmem),
        input_output_aliases={2: 0, 3: 1},   # state slabs updated in place
    )(add_scale, decay, rows, cols, ah, aw)

    I_f = out_rows[1, :N].reshape(N, 1)
    mpot_f = out_rows[2, :N].reshape(N, 1)
    mfr_f = out_rows[3, :N].reshape(N, 1)
    gpot_f = out_cols[:N, 0].reshape(N, 1)
    gfr_f = out_cols[:N, 1].reshape(N, 1)
    return I_f, mpot_f, gpot_f, mfr_f, gfr_f


def reference_run(odor, I0, mpot0, gpot0, gfr0, H0, W0, t_arr, breath_arr, inhale_arr):
    """Pure-numpy reference reproducing the PyTorch module semantics step by step."""
    odor, I, mpot, gpot, gfr, H0, W0 = (np.asarray(a, np.float64)
                                        for a in (odor, I0, mpot0, gpot0, gfr0, H0, W0))
    mfr = np.zeros_like(mpot)
    for s in range(len(t_arr)):
        if bool(inhale_arr[s]):
            I = I + odor * 7.0
        else:
            I = I - 7.0 * I / 33.0 * math.e ** ((float(breath_arr[s]) - float(t_arr[s])) / 33.0)
        mpot = mpot - 2.0 * (H0 @ gfr + mpot / 7.0 - I)
        mfr = np.where(mpot < 1.0,
                       0.14 + 0.14 * np.tanh((mpot - 1.0) / 0.14),
                       0.14 + 1.4 * np.tanh((mpot - 1.0) / 1.4))
        gpot = gpot + 2.0 * (W0 @ mfr - gpot / 7.0 + 0.1)
        gfr = np.where(gpot < 1.0,
                       0.29 + 0.29 * np.tanh((gpot - 1.0) / 0.29),
                       0.29 + 2.9 * np.tanh((gpot - 1.0) / 2.9))
    return I, mpot, gpot, mfr, gfr


if __name__ == "__main__":
    key = jax.random.PRNGKey(0)
    # Deterministic odor pattern with magnitudes consistent with the module's data.
    odor = jax.random.uniform(key, (N, 1), dtype=jnp.float32) * 0.003

    # Connectivity matrices exactly as in MembranePotential.__init__.
    H0 = jnp.array(
        [[0.3, 0.9, 0, 0, 0, 0, 0, 0, 0, 0.7],
         [0.9, 0.4, 1.0, 0, 0, 0, 0, 0, 0, 0],
         [0, 0.8, 0.3, 0.8, 0, 0, 0, 0, 0, 0],
         [0, 0, 0.7, 0.5, 0.9, 0, 0, 0, 0, 0],
         [0, 0, 0, 0.8, 0.3, 0.3, 0, 0, 0, 0],
         [0, 0, 0, 0, 0.7, 0.3, 0.9, 0, 0, 0],
         [0, 0, 0, 0, 0, 0.7, 0.4, 0.9, 0, 0],
         [0, 0, 0, 0, 0, 0, 0.5, 0.5, 0.7, 0],
         [0, 0, 0, 0, 0, 0, 0, 0.9, 0.3, 0.9],
         [0.7, 0, 0, 0, 0, 0, 0, 0, 0.8, 0.3]], dtype=jnp.float32)
    W0 = jnp.array(
        [[0.3, 0.7, 0, 0, 0, 0, 0, 0, 0.5, 0.3],
         [0.3, 0.2, 0.5, 0, 0, 0, 0, 0, 0, 0.7],
         [0, 0.1, 0.3, 0.5, 0, 0, 0, 0, 0, 0],
         [0, 0.5, 0.2, 0.2, 0.5, 0, 0, 0, 0, 0],
         [0.5, 0, 0, 0.5, 0.1, 0.9, 0, 0, 0, 0],
         [0, 0, 0, 0, 0.3, 0.3, 0.5, 0.4, 0, 0],
         [0, 0, 0, 0.6, 0, 0.2, 0.3, 0.5, 0, 0],
         [0, 0, 0, 0, 0, 0, 0.5, 0.3, 0.5, 0],
         [0, 0, 0, 0, 0, 0.2, 0, 0.2, 0.3, 0.7],
         [0.7, 0, 0, 0, 0, 0, 0, 0.2, 0.3, 0.5]], dtype=jnp.float32)

    # Initial module state, exactly as in the __init__ methods.
    I0 = jnp.ones((N, 1), jnp.float32) * 0.243   # Receptors.I
    mpot0 = jnp.ones((N, 1), jnp.float32) * 0.3  # Mitral potential
    gpot0 = jnp.ones((N, 1), jnp.float32) * 0.3  # Granule potential
    gfr0 = jnp.zeros((N, 1), jnp.float32)        # Granule firing rate

    breath = 370.0   # data[1][period - 1] with period = 1

    # --- correctness checks (short horizons so fp32 round-off cannot be amplified
    #     by the near-threshold dynamics of this discrete map) -------------------
    def check(T, inhale_fn, tol):
        t_arr = jnp.arange(T, dtype=jnp.float32) + 400.0
        breath_arr = jnp.full((T,), breath, jnp.float32)
        inhale_arr = jnp.array([bool(inhale_fn(s)) for s in range(T)])
        outs = jax.block_until_ready(
            olfactory_bulb_run(odor, I0, mpot0, gpot0, gfr0, H0, W0,
                               t_arr, breath_arr, inhale_arr))
        ref = reference_run(odor, I0, mpot0, gpot0, gfr0, H0, W0,
                            np.asarray(t_arr), np.asarray(breath_arr),
                            np.asarray(inhale_arr))
        for got, want in zip(outs, ref):
            np.testing.assert_allclose(np.asarray(got), want, rtol=tol, atol=tol)

    check(1, lambda s: True, 1e-4)    # single inhale step (original demo call)
    check(1, lambda s: False, 1e-4)   # single exhale step
    check(8, lambda s: s < 4, 5e-3)   # short mixed inhale/exhale cycle

    # --- long rollout: 200 dynamics steps in ONE pallas_call --------------------
    T = 200
    t_arr = jnp.arange(T, dtype=jnp.float32) + 400.0
    breath_arr = jnp.full((T,), breath, jnp.float32)
    inhale_arr = (jnp.arange(T) // 25) % 2 == 0
    outs = jax.block_until_ready(
        olfactory_bulb_run(odor, I0, mpot0, gpot0, gfr0, H0, W0,
                           t_arr, breath_arr, inhale_arr))
    assert all(bool(jnp.all(jnp.isfinite(o))) for o in outs)

    print("KERNEL_OK")
</pallas_src>

<mosaic_0001>
module attributes {stable_mosaic.version = 11 : i64} {
  func.func @olfactory_bulb_kernel(%arg0: memref<1xf32, #tpu.memory_space<smem>>, %arg1: memref<1xf32, #tpu.memory_space<smem>>, %arg2: memref<8x128xf32, #tpu.memory_space<vmem>>, %arg3: memref<16x2xf32, #tpu.memory_space<vmem>>, %arg4: memref<16x128xf32, #tpu.memory_space<vmem>>, %arg5: memref<16x128xf32, #tpu.memory_space<vmem>>, %arg6: memref<8x128xf32, #tpu.memory_space<vmem>>, %arg7: memref<16x2xf32, #tpu.memory_space<vmem>>) attributes {dimension_semantics = [], scalar_prefetch = 0 : i64, scratch_operands = 0 : i64, tpu.core_type = #tpu.core_type<tc>} {
    %c0 = arith.constant 0 : index
    %c0_0 = arith.constant 0 : index
    %0 = vector.load %arg2[%c0, %c0_0] : memref<8x128xf32, #tpu.memory_space<vmem>>, vector<1x128xf32>
    %c0_1 = arith.constant 0 : index
    %c0_2 = arith.constant 0 : index
    %1 = vector.load %arg4[%c0_1, %c0_2] : memref<16x128xf32, #tpu.memory_space<vmem>>, vector<16x128xf32>
    %c0_3 = arith.constant 0 : index
    %c0_4 = arith.constant 0 : index
    %2 = vector.load %arg5[%c0_3, %c0_4] : memref<16x128xf32, #tpu.memory_space<vmem>>, vector<16x128xf32>
    %c1 = arith.constant 1 : index
    %c0_5 = arith.constant 0 : index
    %3 = vector.load %arg2[%c1, %c0_5] : memref<8x128xf32, #tpu.memory_space<vmem>>, vector<1x128xf32>
    %c2 = arith.constant 2 : index
    %c0_6 = arith.constant 0 : index
    %4 = vector.load %arg2[%c2, %c0_6] : memref<8x128xf32, #tpu.memory_space<vmem>>, vector<1x128xf32>
    %c0_7 = arith.constant 0 : index
    %c0_8 = arith.constant 0 : index
    %5 = vector.load %arg3[%c0_7, %c0_8] : memref<16x2xf32, #tpu.memory_space<vmem>>, vector<16x1xf32>
    %c0_9 = arith.constant 0 : index
    %c1_10 = arith.constant 1 : index
    %6 = vector.load %arg3[%c0_9, %c1_10] : memref<16x2xf32, #tpu.memory_space<vmem>>, vector<16x1xf32>
    %c0_i32 = arith.constant 0 : i32
    %7 = arith.index_cast %c0_i32 : i32 to index
    %8 = memref.load %arg0[%7] : memref<1xf32, #tpu.memory_space<smem>>
    %9 = arith.index_cast %c0_i32 : i32 to index
    %10 = memref.load %arg1[%9] : memref<1xf32, #tpu.memory_space<smem>>
    %11 = vector.broadcast %8 : f32 to vector<1x128xf32>
    %12 = arith.mulf %11, %0 : vector<1x128xf32>
    %13 = arith.addf %3, %12 : vector<1x128xf32>
    %14 = vector.broadcast %10 : f32 to vector<1x128xf32>
    %15 = arith.mulf %14, %3 : vector<1x128xf32>
    %16 = arith.subf %13, %15 : vector<1x128xf32>
    %17 = vector.broadcast %6 : vector<16x1xf32> to vector<16x128xf32>
    %18 = arith.mulf %17, %1 : vector<16x128xf32>
    %cst = arith.constant dense<0.000000e+00> : vector<128xf32>
    %19 = vector.multi_reduction <add>, %18, %cst [0] : vector<16x128xf32> to vector<128xf32>
    %20 = vector.shape_cast %19 : vector<128xf32> to vector<1x128xf32>
    %cst_11 = arith.constant 0.142857149 : f32
    %21 = vector.broadcast %cst_11 : f32 to vector<1x128xf32>
    %22 = arith.mulf %4, %21 : vector<1x128xf32>
    %23 = arith.addf %20, %22 : vector<1x128xf32>
    %24 = arith.subf %23, %16 : vector<1x128xf32>
    %cst_12 = arith.constant 2.000000e+00 : f32
    %25 = vector.broadcast %cst_12 : f32 to vector<1x128xf32>
    %26 = arith.mulf %25, %24 : vector<1x128xf32>
    %27 = arith.subf %4, %26 : vector<1x128xf32>
    %cst_13 = arith.constant 1.000000e+00 : f32
    %28 = vector.broadcast %cst_13 : f32 to vector<1x128xf32>
    %29 = arith.cmpf olt, %27, %28 : vector<1x128xf32>
    %cst_14 = arith.constant 1.400000e-01 : f32
    %cst_15 = arith.constant 1.400000e+00 : f32
    %30 = vector.broadcast %cst_14 : f32 to vector<1x128xf32>
    %31 = vector.broadcast %cst_15 : f32 to vector<1x128xf32>
    %32 = arith.select %29, %30, %31 : vector<1x128xi1>, vector<1x128xf32>
    %cst_16 = arith.constant 7.14285707 : f32
    %cst_17 = arith.constant 0.714285731 : f32
    %33 = vector.broadcast %cst_16 : f32 to vector<1x128xf32>
    %34 = vector.broadcast %cst_17 : f32 to vector<1x128xf32>
    %35 = arith.select %29, %33, %34 : vector<1x128xi1>, vector<1x128xf32>
    %cst_18 = arith.constant 1.000000e+00 : f32
    %36 = vector.broadcast %cst_18 : f32 to vector<1x128xf32>
    %37 = arith.subf %27, %36 : vector<1x128xf32>
    %38 = arith.mulf %37, %35 : vector<1x128xf32>
    %39 = math.tanh %38 : vector<1x128xf32>
    %40 = arith.mulf %32, %39 : vector<1x128xf32>
    %cst_19 = arith.constant 1.400000e-01 : f32
    %41 = vector.broadcast %cst_19 : f32 to vector<1x128xf32>
    %42 = arith.addf %41, %40 : vector<1x128xf32>
    %43 = vector.broadcast %42 : vector<1x128xf32> to vector<16x128xf32>
    %44 = arith.mulf %2, %43 : vector<16x128xf32>
    %cst_20 = arith.constant dense<0.000000e+00> : vector<16xf32>
    %45 = vector.multi_reduction <add>, %44, %cst_20 [1] : vector<16x128xf32> to vector<16xf32>
    %46 = vector.shape_cast %45 : vector<16xf32> to vector<16x1xf32>
    %cst_21 = arith.constant 0.142857149 : f32
    %47 = vector.broadcast %cst_21 : f32 to vector<16x1xf32>
    %48 = arith.mulf %5, %47 : vector<16x1xf32>
    %49 = arith.subf %46, %48 : vector<16x1xf32>
    %cst_22 = arith.constant 1.000000e-01 : f32
    %50 = vector.broadcast %cst_22 : f32 to vector<16x1xf32>
    %51 = arith.addf %49, %50 : vector<16x1xf32>
    %cst_23 = arith.constant 2.000000e+00 : f32
    %52 = vector.broadcast %cst_23 : f32 to vector<16x1xf32>
    %53 = arith.mulf %52, %51 : vector<16x1xf32>
    %54 = arith.addf %5, %53 : vector<16x1xf32>
    %cst_24 = arith.constant 1.000000e+00 : f32
    %55 = vector.broadcast %cst_24 : f32 to vector<16x1xf32>
    %56 = arith.cmpf olt, %54, %55 : vector<16x1xf32>
    %cst_25 = arith.constant 2.900000e-01 : f32
    %cst_26 = arith.constant 2.900000e+00 : f32
    %57 = vector.broadcast %cst_25 : f32 to vector<16x1xf32>
    %58 = vector.broadcast %cst_26 : f32 to vector<16x1xf32>
    %59 = arith.select %56, %57, %58 : vector<16x1xi1>, vector<16x1xf32>
    %cst_27 = arith.constant 3.4482758 : f32
    %cst_28 = arith.constant 0.344827592 : f32
    %60 = vector.broadcast %cst_27 : f32 to vector<16x1xf32>
    %61 = vector.broadcast %cst_28 : f32 to vector<16x1xf32>
    %62 = arith.select %56, %60, %61 : vector<16x1xi1>, vector<16x1xf32>
    %cst_29 = arith.constant 1.000000e+00 : f32
    %63 = vector.broadcast %cst_29 : f32 to vector<16x1xf32>
    %64 = arith.subf %54, %63 : vector<16x1xf32>
    %65 = arith.mulf %64, %62 : vector<16x1xf32>
    %66 = math.tanh %65 : vector<16x1xf32>
    %67 = arith.mulf %59, %66 : vector<16x1xf32>
    %cst_30 = arith.constant 2.900000e-01 : f32
    %68 = vector.broadcast %cst_30 : f32 to vector<16x1xf32>
    %69 = arith.addf %68, %67 : vector<16x1xf32>
    %c1_i32 = arith.constant 1 : i32
    %cst_31 = arith.constant 1.000000e+00 : f32
    %70 = vector.broadcast %cst_31 : f32 to vector<1x128xf32>
    %71 = arith.cmpf olt, %27, %70 : vector<1x128xf32>
    %cst_32 = arith.constant 1.400000e-01 : f32
    %cst_33 = arith.constant 1.400000e+00 : f32
    %72 = vector.broadcast %cst_32 : f32 to vector<1x128xf32>
    %73 = vector.broadcast %cst_33 : f32 to vector<1x128xf32>
    %74 = arith.select %71, %72, %73 : vector<1x128xi1>, vector<1x128xf32>
    %cst_34 = arith.constant 7.14285707 : f32
    %cst_35 = arith.constant 0.714285731 : f32
    %75 = vector.broadcast %cst_34 : f32 to vector<1x128xf32>
    %76 = vector.broadcast %cst_35 : f32 to vector<1x128xf32>
    %77 = arith.select %71, %75, %76 : vector<1x128xi1>, vector<1x128xf32>
    %cst_36 = arith.constant 1.000000e+00 : f32
    %78 = vector.broadcast %cst_36 : f32 to vector<1x128xf32>
    %79 = arith.subf %27, %78 : vector<1x128xf32>
    %80 = arith.mulf %79, %77 : vector<1x128xf32>
    %81 = math.tanh %80 : vector<1x128xf32>
    %82 = arith.mulf %74, %81 : vector<1x128xf32>
    %cst_37 = arith.constant 1.400000e-01 : f32
    %83 = vector.broadcast %cst_37 : f32 to vector<1x128xf32>
    %84 = arith.addf %83, %82 : vector<1x128xf32>
    %c0_38 = arith.constant 0 : index
    %c0_39 = arith.constant 0 : index
    %85 = vector.load %arg6[%c0_38, %c0_39] : memref<8x128xf32, #tpu.memory_space<vmem>>, vector<1x128xf32>
    tpu.vector_store %arg6[%c0_38, %c0_39], %0 {strides = array<i32>} : memref<8x128xf32, #tpu.memory_space<vmem>>, vector<1x128xf32>,
    %c1_40 = arith.constant 1 : index
    %c0_41 = arith.constant 0 : index
    %86 = vector.load %arg6[%c1_40, %c0_41] : memref<8x128xf32, #tpu.memory_space<vmem>>, vector<1x128xf32>
    tpu.vector_store %arg6[%c1_40, %c0_41], %16 {strides = array<i32>} : memref<8x128xf32, #tpu.memory_space<vmem>>, vector<1x128xf32>,
    %c2_42 = arith.constant 2 : index
    %c0_43 = arith.constant 0 : index
    %87 = vector.load %arg6[%c2_42, %c0_43] : memref<8x128xf32, #tpu.memory_space<vmem>>, vector<1x128xf32>
    tpu.vector_store %arg6[%c2_42, %c0_43], %27 {strides = array<i32>} : memref<8x128xf32, #tpu.memory_space<vmem>>, vector<1x128xf32>,
    %c3 = arith.constant 3 : index
    %c0_44 = arith.constant 0 : index
    %88 = vector.load %arg6[%c3, %c0_44] : memref<8x128xf32, #tpu.memory_space<vmem>>, vector<1x128xf32>
    tpu.vector_store %arg6[%c3, %c0_44], %84 {strides = array<i32>} : memref<8x128xf32, #tpu.memory_space<vmem>>, vector<1x128xf32>,
    %cst_45 = arith.constant 0.000000e+00 : f32
    %89 = vector.broadcast %cst_45 : f32 to vector<4x128xf32>
    %c4 = arith.constant 4 : index
    %c0_46 = arith.constant 0 : index
    %90 = vector.load %arg6[%c4, %c0_46] : memref<8x128xf32, #tpu.memory_space<vmem>>, vector<4x128xf32>
    tpu.vector_store %arg6[%c4, %c0_46], %89 {strides = array<i32>} : memref<8x128xf32, #tpu.memory_space<vmem>>, vector<4x128xf32>,
    %c0_47 = arith.constant 0 : index
    %c0_48 = arith.constant 0 : index
    %91 = vector.load %arg7[%c0_47, %c0_48] : memref<16x2xf32, #tpu.memory_space<vmem>>, vector<16x1xf32>
    tpu.vector_store %arg7[%c0_47, %c0_48], %54 {strides = array<i32>} : memref<16x2xf32, #tpu.memory_space<vmem>>, vector<16x1xf32>,
    %c0_49 = arith.constant 0 : index
    %c1_50 = arith.constant 1 : index
    %92 = vector.load %arg7[%c0_49, %c1_50] : memref<16x2xf32, #tpu.memory_space<vmem>>, vector<16x1xf32>
    tpu.vector_store %arg7[%c0_49, %c1_50], %69 {strides = array<i32>} : memref<16x2xf32, #tpu.memory_space<vmem>>, vector<16x1xf32>,
    return
  }
}

</mosaic_0001>

<bundles_post_ra>
// kernel: olfactory_bulb_run.1
= control target key start
LH: loop header
LB: loop body
LE: loop exit
PB: predicated region body
PF: predicated region fallthrough
CT: control target
= control target key end

     0   :  { %v156_v0 = vmov 1   ;;  %v157_v11 = vmov 0.0   ;;  %v158_v32 = vmov 0.71428573   ;;  %v76_v35 = vlaneseq  ;;  %s162_s30 = smov 1   ;;  %s273_s3 = inlined_call_operand.vmem [shape: f32[16,2], index: 3, kind: input, shape index: {}, may-alias: {3,7}]   ;;  %s274_s0 = inlined_call_operand.<no memory space> [shape: f32[1], index: 0, kind: input, shape index: {}]   ;;  %s275_s2 = inlined_call_operand.vmem [shape: f32[8,128], index: 2, kind: input, shape index: {}, may-alias: {2,6}]   ;;  %s276_s1 = inlined_call_operand.<no memory space> [shape: f32[1], index: 1, kind: input, shape index: {}]   ;;  %s277_s6 = inlined_call_operand.vmem [shape: f32[8,128], index: 6, kind: output, shape index: {0}, may-alias: {2,6}]   ;;  %s278_s4 = inlined_call_operand.vmem [shape: f32[16,128], index: 4, kind: input, shape index: {}]   ;;  %s279_s5 = inlined_call_operand.vmem [shape: f32[16,128], index: 5, kind: input, shape index: {}]   ;;  %s280_s7 = inlined_call_operand.vmem [shape: f32[16,2], index: 7, kind: output, shape index: {1}, may-alias: {3,7}]  }
   0x1   :  { %149 = vset.pattern.permute.xlu0 %v156_v0  ;;  %v206_v1 = vld [vmem:[%s273_s3] sm:$0xff]  ;;  %v212_v2 = vld [vmem:[%s273_s3 + $0x8] sm:$0xff]  ;;  %v38_v4 = vstv %s274_s0  ;;  %v41_v7 = vstv %s276_s1  ;;  %v159_v38 = vmov 1.4   ;;  %vm117_vm1 = vcmask 7168  }
   0x2   :  { %46 = vperm.xlu0 %149, %v206_v1   ;;  %v27_v3 = vld [vmem:[%s275_s2] sm:$0x1]  ;;  %v32_v6 = vld [vmem:[%s275_s2 + $0x1] sm:$0x1]  ;;  %v29_v14 = vld [vmem:[%s278_s4 + $0x8] sm:$0xff]  ;;  %v77_v36 = vshrl.u32 %v76_v35, 7 }
   0x3   :  { %v39_v5 = vmul.f32 %v38_v4, %v27_v3  ;;  %v42_v9 = vmul.f32 %v41_v7, %v32_v6  ;;  %112 = vst [vmem:[%s277_s6] sm:$0x1] %v27_v3  ;;  %116 = vst [vmem:[%s277_s6 + $0x4] sm:$0xf] %v157_v11  ;;  %v28_v13 = vld [vmem:[%s278_s4] sm:$0xff]  ;;  %v31_v46 = vld [vmem:[%s279_s5 + $0x8] sm:$0xff]  ;;  %vm128_vm4 = vcmask 15368  }
   0x4   :  { %v78_v41 = vsub.s32 0, %v77_v36  ;;  %v30_v43 = vld [vmem:[%s279_s5] sm:$0xff]  ;;  %v86_v48 = vmul.f32 0.14285715, %v206_v1  ;;  %v87_v51 = vmul.f32 0.14285715, %v212_v2 }
   0x5   :  { %v40_v8 = vadd.f32 %v39_v5, %v32_v6  ;;  %v160_v60 = vmov 0.3448276   ;;  %v161_v5 = vmov 2.9  }
   0x6   :  { %51 = vperm.xlu0 %149, %v212_v2  }
   0x7   :  { %v43_v10 = vsub.f32 %v40_v8, %v42_v9 }
   0x9   :  { %113 = vst [vmem:[%s277_s6 + $0x1] sm:$0x1] %v43_v10 }
  0x10   :  { %v33_v22 = vld [vmem:[%s275_s2 + $0x2] sm:$0x1] }
  0x11   :  { %v63_v25 = vmul.f32 0.14285715, %v33_v22 }
  0x7d   :  { %v47_v12 = vpop.permute.xlu0 %46 }
  0x7e   :  { %v54_v16 = vmul.f32 %v47_v12, %v28_v13 }
  0x81   :  { %v52_v15 = vpop.permute.xlu0 %51 }
  0x82   :  { %v55_v17 = vmul.f32 %v52_v15, %v29_v14 }
  0x84   :  { %v56_v18 = vadd.f32 %v55_v17, %v54_v16 }
  0x86   :  { %v57_v19 = vrot.slane %v56_v18, 4 }
  0x88   :  { %v58_v20 = vadd.f32 %v57_v19, %v56_v18 }
  0x8a   :  { %v59_v21 = vrot.slane %v58_v20, 2 }
  0x8c   :  { %v60_v23 = vadd.f32 %v59_v21, %v58_v20 }
  0x8e   :  { %v61_v24 = vrot.slane %v60_v23, 1 }
  0x90   :  { %v62_v26 = vadd.f32 %v61_v24, %v60_v23 }
  0x92   :  { %v64_v27 = vadd.f32 %v63_v25, %v62_v26 }
  0x94   :  { %v65_v28 = vsub.f32 %v64_v27, %v43_v10 }
  0x96   :  { %v66_v29 = vmul.f32 2.0, %v65_v28 }
  0x98   :  { %v67_v30 = vsub.f32 %v33_v22, %v66_v29 }
  0x9a   :  { %vm68_vm0 = vcmp.lt.f32.partialorder %v67_v30, 1.0  ;;  %v139_v31 = vadd.f32 -1.0, %v67_v30  ;;  %114 = vst [vmem:[%s277_s6 + $0x2] sm:$0x1] %v67_v30 }
  0x9b   :  { %v70_v33 = vsel %vm68_vm0, 7.142857, %v158_v32  ;;  %v69_v39 = vsel %vm68_vm0, 0.14, %v159_v38 }
  0x9c   :  { %v72_v34 = vmul.f32 %v139_v31, %v70_v33 }
  0x9e   :  { %150 = vtanh.f32 %v72_v34 }
  0xab   :  { %v151_v37 = vpop.eup %150 }
  0xac   :  { %v74_v40 = vmul.f32 %v151_v37, %v69_v39 }
  0xae   :  { %v75_v42 = vadd.f32 0.14, %v74_v40 }
  0xb0   :  { %v79_v44 = vrot.slane %v75_v42, %v78_v41  ;;  %115 = vst [vmem:[%s277_s6 + $0x3] sm:$0x1] %v75_v42 }
  0xb2   :  { %v80_v45 = vmul.f32 %v79_v44, %v30_v43  ;;  %v81_v47 = vmul.f32 %v79_v44, %v31_v46 }
  0xb4   :  { %82 = vadd.xlane.f32.xlu1 %v80_v45 }
  0xb8   :  { %84 = vadd.xlane.f32.xlu1 %v81_v47 }
 0x13d   :  { %v83_v49 = vpop.xlane.xlu1 %82 }
 0x13e   :  { %v88_v50 = vsub.f32 %v83_v49, %v86_v48 }
 0x140   :  { %v90_v52 = vadd.f32 0.1, %v88_v50 }
 0x141   :  { %v85_v53 = vpop.xlane.xlu1 %84 }
 0x142   :  { %v92_v54 = vmul.f32 2.0, %v90_v52  ;;  %v89_v55 = vsub.f32 %v85_v53, %v87_v51 }
 0x144   :  { %v94_v56 = vadd.f32 %v92_v54, %v206_v1  ;;  %v91_v57 = vadd.f32 0.1, %v89_v55 }
 0x146   :  { %v140_v58 = vadd.f32 -1.0, %v94_v56  ;;  %v93_v59 = vmul.f32 2.0, %v91_v57  ;;  %vm96_vm2 = vcmp.lt.f32.partialorder %v94_v56, 1.0  ;;  %118 = vst.msk [vmem:[%s280_s7] sm:$0xff] %vm117_vm1, %v94_v56 }
 0x147   :  { %v100_v61 = vsel %vm96_vm2, 3.4482758, %v160_v60  ;;  %v98_v6 = vsel %vm96_vm2, 0.29, %v161_v5 }
 0x148   :  { %v95_v62 = vadd.f32 %v93_v59, %v212_v2  ;;  %v104_v63 = vmul.f32 %v140_v58, %v100_v61 }
 0x14a   :  { %v141_v0 = vadd.f32 -1.0, %v95_v62  ;;  %152 = vtanh.f32 %v104_v63  ;;  %vm97_vm3 = vcmp.lt.f32.partialorder %v95_v62, 1.0  ;;  %119 = vst.msk [vmem:[%s280_s7 + $0x8] sm:$0xff] %vm117_vm1, %v95_v62 }
 0x14b   :  { %v101_v1 = vsel %vm97_vm3, 3.4482758, %v160_v60  ;;  %v99_v10 = vsel %vm97_vm3, 0.29, %v161_v5 }
 0x14c   :  { %v105_v3 = vmul.f32 %v141_v0, %v101_v1 }
 0x14e   :  { %154 = vtanh.f32 %v105_v3 }
 0x157   :  { %v153_v4 = vpop.eup %152 }
 0x158   :  { %v108_v7 = vmul.f32 %v153_v4, %v98_v6 }
 0x15a   :  { %v110_v8 = vadd.f32 0.29, %v108_v7 }
 0x15b   :  { %v155_v9 = vpop.eup %154 }
 0x15c   :  { %122 = vrot.lane.b32.xlu0 %v110_v8, %s162_s30  ;;  %v109_v2 = vmul.f32 %v155_v9, %v99_v10 }
 0x15e   :  { %v111_v11 = vadd.f32 0.29, %v109_v2 }
 0x160   :  { %124 = vrot.lane.b32.xlu1 %v111_v11, %s162_s30 }
 0x1ce   :  { %v123_v12 = vpop.permute.xlu0 %122 }
 0x1cf   :  { %129 = vst.msk [vmem:[%s280_s7] sm:$0xff] %vm128_vm4, %v123_v12 }
 0x1d2   :  { %v125_v13 = vpop.permute.xlu1 %124 }
 0x1d3   :  { %130 = vst.msk [vmem:[%s280_s7 + $0x8] sm:$0xff] %vm128_vm4, %v125_v13 }

</bundles_post_ra>
